<compile_context>
chip_gen: v6e
topology: v6e:2x2x1
jax: 0.10.0
libtpu: 0.0.40
codegen_flags: <defaults>
</compile_context>

<pallas_src>
import functools

import numpy as np
import jax
import jax.numpy as jnp
from jax.experimental import pallas as pl
from jax.experimental.pallas import tpu as pltpu


# ---------------------------------------------------------------------------
# Generation-aware VMEM / tiling heuristics
# ---------------------------------------------------------------------------
def _vmem_limit_bytes():
    """~75% of physical VMEM: ~48 MiB on v7x (64 MiB/TC), ~96 MiB on v5e/v6e (128 MiB)."""
    try:
        cap = int(pltpu.get_tpu_info().vmem_capacity_bytes)
    except Exception:  # interpret mode / unknown part
        cap = 128 * 1024 * 1024
    return min((cap * 3) // 4, 100 * 1024 * 1024)


def _pick_head_ktile(C2, vmem_limit):
    """Input-channel (K) tile for the head: 512 on 128 MiB-VMEM parts, 256 on v7x."""
    target = 512 if vmem_limit >= (80 << 20) else 256
    for cand in (target, target // 2, 128):
        if C2 > cand and C2 % cand == 0:
            return cand
    return C2


def _pick_hw_tile(HW, max_tile=512):
    """Largest 128-multiple HW tile (<= max_tile) that divides HW; else the full extent."""
    if HW <= max_tile:
        return HW
    for t in range(max_tile, 127, -128):
        if HW % t == 0:
            return t
    return HW  # TODO(synk): pad HW to a 128-multiple in the wrapper for odd resolutions.


# ---------------------------------------------------------------------------
# Kernel 1: fused adaptive-avg-pool (all branches, one matmul, HW-tiled reduction)
#           + stacked 1x1 conv (+eval-BN folded) + ReLU
# ---------------------------------------------------------------------------
def _pool_conv_kernel(x_ref, kpoolT_ref, w_ref, b_ref, y_ref, acc_ref):
    t = pl.program_id(1)

    @pl.when(t == 0)
    def _init():
        acc_ref[...] = jnp.zeros_like(acc_ref)

    # all 4 adaptive-avg-pools at once: (C, tHW) @ (tHW, 50), accumulated over HW tiles.
    acc_ref[...] += jnp.dot(x_ref[0], kpoolT_ref[...],
                            preferred_element_type=jnp.float32)

    @pl.when(t == pl.num_programs(1) - 1)
    def _finalize():
        # all 4 branch 1x1 convs fused into one stacked (C, C) @ (C, 50) matmul
        # (off-branch columns are junk; the upsample kernel slices the right block).
        y = jnp.dot(w_ref[...], acc_ref[...].astype(jnp.bfloat16),
                    preferred_element_type=jnp.float32) + b_ref[...]
        y_ref[0] = jnp.maximum(y, 0.0).astype(y_ref.dtype)


def ppm_pool_conv(x_cm, kpoolT, w_stack, b_stack):
    """x_cm: (B, C, HW) bf16 -> pooled+conv'd+ReLU'd branch activations (B, C, 50) bf16."""
    B, C, HW = x_cm.shape
    S = kpoolT.shape[1]
    tHW = _pick_hw_tile(HW)
    nhw = HW // tHW
    vmem = _vmem_limit_bytes()
    return pl.pallas_call(
        _pool_conv_kernel,
        out_shape=jax.ShapeDtypeStruct((B, C, S), jnp.bfloat16),
        grid=(B, nhw),
        in_specs=[
            pl.BlockSpec((1, C, tHW), lambda b, t: (b, 0, t)),
            pl.BlockSpec((tHW, S), lambda b, t: (t, 0)),
            pl.BlockSpec((C, C), lambda b, t: (0, 0)),
            pl.BlockSpec((C, 1), lambda b, t: (0, 0)),
        ],
        out_specs=pl.BlockSpec((1, C, S), lambda b, t: (b, 0, 0)),
        scratch_shapes=[pltpu.VMEM((C, S), jnp.float32)],
        compiler_params=pltpu.CompilerParams(
            dimension_semantics=("parallel", "arbitrary"),
            vmem_limit_bytes=vmem),
    )(x_cm, kpoolT, w_stack, b_stack)


# ---------------------------------------------------------------------------
# Kernel 2: bilinear upsample (align_corners=True) of every branch + concat with x,
#           gridded over (B, HW tiles) so VMEM use is independent of H*W.
# ---------------------------------------------------------------------------
def _upsample_concat_kernel(x_ref, y_ref, kupT_ref, o_ref, *, pool_sizes, Cb):
    C = x_ref.shape[1]
    # identity branch: bf16 copy of x into the first C channels of the concat slab.
    o_ref[0, 0:C, :] = x_ref[0]
    off = 0
    for bi, s in enumerate(pool_sizes):
        ss = s * s
        yb = y_ref[0, bi * Cb:(bi + 1) * Cb, off:off + ss]        # (Cb, ss) bf16
        # bilinear upsample (align_corners=True): (Cb, ss) @ (ss, tHW)
        up = jnp.dot(yb, kupT_ref[off:off + ss, :],
                     preferred_element_type=jnp.float32)          # (Cb, tHW) f32
        o_ref[0, C + bi * Cb: C + (bi + 1) * Cb, :] = up.astype(o_ref.dtype)
        off += ss


def ppm_upsample_concat(x_cm, y_all, kupT, pool_sizes):
    """x_cm (B,C,HW) bf16 + branch acts (B,C,50) bf16 -> concat slab (B, 2C, HW) bf16."""
    B, C, HW = x_cm.shape
    S = kupT.shape[0]
    nb = len(pool_sizes)
    Cb = C // nb
    C2 = 2 * C
    tHW = _pick_hw_tile(HW)
    nhw = HW // tHW
    return pl.pallas_call(
        functools.partial(_upsample_concat_kernel,
                          pool_sizes=tuple(pool_sizes), Cb=Cb),
        out_shape=jax.ShapeDtypeStruct((B, C2, HW), jnp.bfloat16),
        grid=(B, nhw),
        in_specs=[
            pl.BlockSpec((1, C, tHW), lambda b, t: (b, 0, t)),
            pl.BlockSpec((1, C, S), lambda b, t: (b, 0, 0)),
            pl.BlockSpec((S, tHW), lambda b, t: (0, t)),
        ],
        out_specs=pl.BlockSpec((1, C2, tHW), lambda b, t: (b, 0, t)),
        compiler_params=pltpu.CompilerParams(
            dimension_semantics=("parallel", "parallel"),
            vmem_limit_bytes=_vmem_limit_bytes()),
    )(x_cm, y_all, kupT)


# ---------------------------------------------------------------------------
# Kernel 3: fused head — 3x3 conv (+BN) + ReLU + 1x1 classifier, K-tiled, no im2col
# ---------------------------------------------------------------------------
def _head_kernel(x_ref, w3_ref, b3_ref, w1_ref, b1_ref, o_ref, acc_ref, *, H, W):
    k = pl.program_id(1)

    @pl.when(k == 0)
    def _init():
        acc_ref[...] = jnp.zeros_like(acc_ref)

    Wp = W + 2
    Lh = H * Wp
    # 3x3 conv = 9 shifted bf16 matmuls over the row-flattened padded slab,
    # accumulated in place (no second live (Cmid, Lh) f32 buffer).
    for ky in range(3):
        for kx in range(3):
            start = ky * Wp + kx
            win = x_ref[0, :, start:start + Lh]                   # (tkc, H*(W+2)) bf16
            acc_ref[...] += jnp.dot(w3_ref[ky * 3 + kx], win,
                                    preferred_element_type=jnp.float32)

    @pl.when(k == pl.num_programs(1) - 1)
    def _finalize():
        # bias + ReLU applied once, in place, on the final K step (correct under K tiling).
        # Dropout(0.1) is identity in eval mode.
        acc_ref[...] = jnp.maximum(acc_ref[...] + b3_ref[...], 0.0)
        logits = jnp.dot(w1_ref[...], acc_ref[...],
                         preferred_element_type=jnp.float32) + b1_ref[...]
        o_ref[0] = logits.astype(o_ref.dtype)                     # lane-dense store


def head_conv_classifier(xpad_flat, w3, b3, w1T, b1, H, W):
    """xpad_flat: (B, 2C, (H+3)*(W+2)) bf16 -> logits (B, nc, H*(W+2)) f32."""
    B, C2, Lp = xpad_flat.shape
    assert Lp == (H + 3) * (W + 2)
    taps, Cmid, _ = w3.shape
    nc = w1T.shape[0]
    Lh = H * (W + 2)
    # every shifted tap window must fit inside the padded slab (this was the old bug):
    assert 2 * (W + 2) + 2 + Lh <= Lp

    vmem = _vmem_limit_bytes()
    tkc = _pick_head_ktile(C2, vmem)          # 512 on v5e/v6e, 256 on v7x, full at toy sizes
    nk = C2 // tkc

    return pl.pallas_call(
        functools.partial(_head_kernel, H=H, W=W),
        out_shape=jax.ShapeDtypeStruct((B, nc, Lh), jnp.float32),
        grid=(B, nk),
        in_specs=[
            pl.BlockSpec((1, tkc, Lp), lambda b, k: (b, k, 0)),
            pl.BlockSpec((taps, Cmid, tkc), lambda b, k: (0, 0, k)),
            pl.BlockSpec((Cmid, 1), lambda b, k: (0, 0)),
            pl.BlockSpec((nc, Cmid), lambda b, k: (0, 0)),
            pl.BlockSpec((nc, 1), lambda b, k: (0, 0)),
        ],
        out_specs=pl.BlockSpec((1, nc, Lh), lambda b, k: (b, 0, 0)),
        scratch_shapes=[pltpu.VMEM((Cmid, Lh), jnp.float32)],
        compiler_params=pltpu.CompilerParams(
            dimension_semantics=("parallel", "arbitrary"),
            vmem_limit_bytes=vmem),
    )(xpad_flat, w3, b3, w1T, b1)


# ---------------------------------------------------------------------------
# Host-side glue: pooling/upsample operators, BN folding, params
# ---------------------------------------------------------------------------
def adaptive_avg_pool_matrix(in_size, out_size):
    """Row i gives the averaging weights of PyTorch AdaptiveAvgPool bin i (exact binning)."""
    m = np.zeros((out_size, in_size), dtype=np.float32)
    for i in range(out_size):
        start = (i * in_size) // out_size
        end = -(-((i + 1) * in_size) // out_size)  # ceil
        m[i, start:end] = 1.0 / (end - start)
    return m


def bilinear_upsample_matrix(in_size, out_size):
    """Row o gives bilinear interpolation weights (align_corners=True) over input positions."""
    m = np.zeros((out_size, in_size), dtype=np.float32)
    if in_size == 1:
        m[:, 0] = 1.0
        return m
    scale = (in_size - 1) / (out_size - 1)
    for o in range(out_size):
        src = o * scale
        i0 = min(int(np.floor(src)), in_size - 1)
        i1 = min(i0 + 1, in_size - 1)
        frac = src - i0
        m[o, i0] += 1.0 - frac
        m[o, i1] += frac
    return m


def init_params(key, in_channels, num_classes, H, W, pool_sizes=(1, 2, 3, 6)):
    eps = 1e-5
    C = in_channels
    nb = len(pool_sizes)
    Cb = C // nb
    C2 = 2 * C
    Cmid = C // 2
    keys = jax.random.split(key, nb + 4)

    # ---- PPM branches: 1x1 conv (no bias) + eval-mode BatchNorm folded, stacked ----
    w_rows, b_rows = [], []
    for bi in range(nb):
        w = jax.random.normal(keys[bi], (Cb, C), jnp.float32) * 0.1      # (Cout, Cin)
        gamma = 1.0 + 0.1 * jnp.arange(Cb, dtype=jnp.float32)
        beta = 0.05 * jnp.arange(Cb, dtype=jnp.float32)
        mean = 0.01 * jnp.arange(Cb, dtype=jnp.float32)
        var = 1.0 + 0.2 * jnp.arange(Cb, dtype=jnp.float32)
        scale = gamma / jnp.sqrt(var + eps)
        w_rows.append(w * scale[:, None])
        b_rows.append((beta - mean * scale)[:, None])
    w_stack = jnp.concatenate(w_rows, axis=0).astype(jnp.bfloat16)       # (C, C)
    b_stack = jnp.concatenate(b_rows, axis=0)                            # (C, 1) f32

    # ---- pooling / upsampling operators (transposed for channel-major matmuls), bf16 ----
    kpool = np.concatenate(
        [np.kron(adaptive_avg_pool_matrix(H, s), adaptive_avg_pool_matrix(W, s))
         for s in pool_sizes], axis=0)                                   # (50, HW)
    kup = np.concatenate(
        [np.kron(bilinear_upsample_matrix(s, H), bilinear_upsample_matrix(s, W))
         for s in pool_sizes], axis=1)                                   # (HW, 50)
    kpoolT = jnp.asarray(kpool.T, jnp.bfloat16)                          # (HW, 50)
    kupT = jnp.asarray(kup.T, jnp.bfloat16)                              # (50, HW)

    # ---- head: 3x3 conv (with bias) + BN folded; per-tap layout (9, Cmid, 2C), bf16 ----
    w3 = jax.random.normal(keys[nb], (Cmid, C2, 3, 3), jnp.float32) * 0.05
    b3 = jax.random.normal(keys[nb + 1], (Cmid,), jnp.float32) * 0.01
    gamma3 = 1.0 + 0.1 * jnp.arange(Cmid, dtype=jnp.float32)
    beta3 = -0.02 * jnp.arange(Cmid, dtype=jnp.float32)
    mean3 = 0.03 * jnp.arange(Cmid, dtype=jnp.float32)
    var3 = 1.0 + 0.1 * jnp.arange(Cmid, dtype=jnp.float32)
    scale3 = gamma3 / jnp.sqrt(var3 + eps)
    w3_f = w3 * scale3[:, None, None, None]
    b3_f = ((b3 - mean3) * scale3 + beta3)[:, None]                      # (Cmid, 1)
    w3_taps = jnp.transpose(w3_f, (2, 3, 0, 1)).reshape(9, Cmid, C2).astype(jnp.bfloat16)

    # ---- classifier 1x1 conv (with bias); tiny epilogue matmul kept in f32 ----
    w1T = jax.random.normal(keys[nb + 2], (num_classes, Cmid), jnp.float32) * 0.1
    b1 = (jax.random.normal(keys[nb + 3], (num_classes,), jnp.float32) * 0.01)[:, None]

    return dict(pool_sizes=tuple(pool_sizes), kpoolT=kpoolT, kupT=kupT,
                w_stack=w_stack, b_stack=b_stack, w3=w3_taps, b3=b3_f, w1T=w1T, b1=b1)


# ---------------------------------------------------------------------------
# Forward pass (NCHW in, NCHW out — no transposes, only free reshapes + one small pad)
# ---------------------------------------------------------------------------
def psp_decoder_forward(x_nchw, params):
    B, C, H, W = x_nchw.shape
    # bf16 activations on the lane-dense (B, C, HW) layout (half the HBM traffic of f32).
    x_cm = x_nchw.reshape(B, C, H * W).astype(jnp.bfloat16)

    # Pyramid Pooling Module: pool+conv+ReLU (K1), then upsample+concat slab (K2).
    branch_acts = ppm_pool_conv(x_cm, params["kpoolT"], params["w_stack"], params["b_stack"])
    slab = ppm_upsample_concat(x_cm, branch_acts, params["kupT"], params["pool_sizes"])
    C2 = slab.shape[1]

    # spatial pad for the 3x3 conv, row-flattened; rows padded (1, 2) so every shifted
    # tap window (start up to 2*(W+2)+2, length H*(W+2)) stays inside the buffer.
    # TODO(synk): fuse this pad into the K2 output to save one bf16 slab round trip.
    xpad = jnp.pad(slab.reshape(B, C2, H, W), ((0, 0), (0, 0), (1, 2), (1, 1)))
    xpad_flat = xpad.reshape(B, C2, (H + 3) * (W + 2))

    # fused 3x3 conv + BN + ReLU + (eval dropout) + 1x1 classifier.
    logits_pad = head_conv_classifier(xpad_flat, params["w3"], params["b3"],
                                      params["w1T"], params["b1"], H, W)  # (B, nc, H*(W+2))
    nc = params["w1T"].shape[0]
    return logits_pad.reshape(B, nc, H, W + 2)[..., :W]                   # (B, nc, H, W)


if __name__ == "__main__":
    key = jax.random.PRNGKey(0)
    B, C, H, W = 2, 8, 16, 16        # in_channels must be divisible by 4 (PPM) and 2 (head)
    num_classes = 3

    k_x, k_p = jax.random.split(key)
    x = jax.random.normal(k_x, (B, C, H, W), jnp.float32)
    params = init_params(k_p, C, num_classes, H, W)

    out = jax.block_until_ready(psp_decoder_forward(x, params))
    assert out.shape == (B, num_classes, H, W), out.shape
    assert bool(jnp.all(jnp.isfinite(out)))
    print("KERNEL_OK")
</pallas_src>

<mosaic_0001>
module attributes {stable_mosaic.version = 11 : i64} {
  func.func @_pool_conv_kernel(%arg0: i32, %arg1: i32, %arg2: memref<1x8x256xbf16, #tpu.memory_space<vmem>>, %arg3: memref<256x50xbf16, #tpu.memory_space<vmem>>, %arg4: memref<8x8xbf16, #tpu.memory_space<vmem>>, %arg5: memref<8x1xf32, #tpu.memory_space<vmem>>, %arg6: memref<1x8x50xbf16, #tpu.memory_space<vmem>>, %arg7: memref<8x50xf32, #tpu.memory_space<vmem>>) attributes {dimension_semantics = [#tpu.dimension_semantics<parallel>, #tpu.dimension_semantics<arbitrary>], iteration_bounds = array<i64: 2, 1>, scalar_prefetch = 0 : i64, scratch_operands = 1 : i64, tpu.core_type = #tpu.core_type<tc>, window_params = [{transform_indices = @transform_0, window_bounds = array<i64: 1, 8, 256>}, {transform_indices = @transform_1, window_bounds = array<i64: 256, 50>}, {pipeline_mode = #tpu.pipeline_mode<synchronous>, transform_indices = @transform_2, window_bounds = array<i64: 8, 8>}, {pipeline_mode = #tpu.pipeline_mode<synchronous>, transform_indices = @transform_3, window_bounds = array<i64: 8, 1>}, {transform_indices = @transform_4, window_bounds = array<i64: 1, 8, 50>}]} {
    %c0_i32 = arith.constant 0 : i32
    %0 = arith.cmpi eq, %arg1, %c0_i32 : i32
    %1 = arith.extui %0 : i1 to i32
    %c0_i32_0 = arith.constant 0 : i32
    %2 = arith.cmpi ne, %1, %c0_i32_0 : i32
    scf.if %2 {
      %cst_11 = arith.constant 0.000000e+00 : f32
      %13 = vector.broadcast %cst_11 : f32 to vector<8x50xf32>
      %c0_12 = arith.constant 0 : index
      %c0_13 = arith.constant 0 : index
      %14 = vector.load %arg7[%c0_12, %c0_13] : memref<8x50xf32, #tpu.memory_space<vmem>>, vector<8x50xf32>
      tpu.vector_store %arg7[%c0_12, %c0_13], %13 {strides = array<i32>} : memref<8x50xf32, #tpu.memory_space<vmem>>, vector<8x50xf32>,
    } else {
    }
    %c0 = arith.constant 0 : index
    %c0_1 = arith.constant 0 : index
    %3 = vector.load %arg7[%c0, %c0_1] : memref<8x50xf32, #tpu.memory_space<vmem>>, vector<8x50xf32>
    %c0_2 = arith.constant 0 : index
    %c0_3 = arith.constant 0 : index
    %c0_4 = arith.constant 0 : index
    %4 = vector.load %arg2[%c0_2, %c0_3, %c0_4] : memref<1x8x256xbf16, #tpu.memory_space<vmem>>, vector<1x8x256xbf16>
    %5 = vector.shape_cast %4 : vector<1x8x256xbf16> to vector<8x256xbf16>
    %c0_5 = arith.constant 0 : index
    %c0_6 = arith.constant 0 : index
    %6 = vector.load %arg3[%c0_5, %c0_6] : memref<256x50xbf16, #tpu.memory_space<vmem>>, vector<256x50xbf16>
    %cst = arith.constant dense<0.000000e+00> : vector<8x50xf32>
    %7 = tpu.matmul %5, %6, %cst {dimension_numbers = #tpu.dot_dimension_numbers<[1], [0], [0], [1], [0, 0, 1, 1], [], []>} : vector<8x256xbf16>, vector<256x50xbf16>, vector<8x50xf32> -> vector<8x50xf32>
    %8 = arith.addf %3, %7 : vector<8x50xf32>
    %c0_7 = arith.constant 0 : index
    %c0_8 = arith.constant 0 : index
    %9 = vector.load %arg7[%c0_7, %c0_8] : memref<8x50xf32, #tpu.memory_space<vmem>>, vector<8x50xf32>
    tpu.vector_store %arg7[%c0_7, %c0_8], %8 {strides = array<i32>} : memref<8x50xf32, #tpu.memory_space<vmem>>, vector<8x50xf32>,
    %c0_i32_9 = arith.constant 0 : i32
    %10 = arith.cmpi eq, %arg1, %c0_i32_9 : i32
    %11 = arith.extui %10 : i1 to i32
    %c0_i32_10 = arith.constant 0 : i32
    %12 = arith.cmpi ne, %11, %c0_i32_10 : i32
    scf.if %12 {
      %c0_11 = arith.constant 0 : index
      %c0_12 = arith.constant 0 : index
      %13 = vector.load %arg4[%c0_11, %c0_12] : memref<8x8xbf16, #tpu.memory_space<vmem>>, vector<8x8xbf16>
      %c0_13 = arith.constant 0 : index
      %c0_14 = arith.constant 0 : index
      %14 = vector.load %arg7[%c0_13, %c0_14] : memref<8x50xf32, #tpu.memory_space<vmem>>, vector<8x50xf32>
      %15 = arith.truncf %14 : vector<8x50xf32> to vector<8x50xbf16>
      %cst_15 = arith.constant dense<0.000000e+00> : vector<8x50xf32>
      %16 = tpu.matmul %13, %15, %cst_15 {dimension_numbers = #tpu.dot_dimension_numbers<[1], [0], [0], [1], [0, 0, 1, 1], [], []>} : vector<8x8xbf16>, vector<8x50xbf16>, vector<8x50xf32> -> vector<8x50xf32>
      %c0_16 = arith.constant 0 : index
      %c0_17 = arith.constant 0 : index
      %17 = vector.load %arg5[%c0_16, %c0_17] : memref<8x1xf32, #tpu.memory_space<vmem>>, vector<8x1xf32>
      %18 = vector.broadcast %17 : vector<8x1xf32> to vector<8x50xf32>
      %19 = arith.addf %16, %18 : vector<8x50xf32>
      %cst_18 = arith.constant 0.000000e+00 : f32
      %20 = vector.broadcast %cst_18 : f32 to vector<8x50xf32>
      %21 = arith.maximumf %19, %20 : vector<8x50xf32>
      %22 = arith.truncf %21 : vector<8x50xf32> to vector<8x50xbf16>
      %c0_19 = arith.constant 0 : index
      %c0_20 = arith.constant 0 : index
      %c0_21 = arith.constant 0 : index
      %23 = vector.load %arg6[%c0_19, %c0_20, %c0_21] : memref<1x8x50xbf16, #tpu.memory_space<vmem>>, vector<1x8x50xbf16>
      %24 = vector.shape_cast %23 : vector<1x8x50xbf16> to vector<8x50xbf16>
      %25 = vector.shape_cast %22 : vector<8x50xbf16> to vector<1x8x50xbf16>
      tpu.vector_store %arg6[%c0_19, %c0_20, %c0_21], %25 {strides = array<i32>} : memref<1x8x50xbf16, #tpu.memory_space<vmem>>, vector<1x8x50xbf16>,
    } else {
    }
    return
  }
  func.func @transform_0(%arg0: i32, %arg1: i32) -> (i32, i32, i32) {
    %c0_i32 = arith.constant 0 : i32
    %c0_i32_0 = arith.constant 0 : i32
    return %arg0, %c0_i32, %arg1 : i32, i32, i32
  }
  func.func @transform_1(%arg0: i32, %arg1: i32) -> (i32, i32) {
    %c0_i32 = arith.constant 0 : i32
    %c0_i32_0 = arith.constant 0 : i32
    return %arg1, %c0_i32 : i32, i32
  }
  func.func @transform_2(%arg0: i32, %arg1: i32) -> (i32, i32) {
    %c0_i32 = arith.constant 0 : i32
    %c0_i32_0 = arith.constant 0 : i32
    %c0_i32_1 = arith.constant 0 : i32
    return %c0_i32, %c0_i32_0 : i32, i32
  }
  func.func @transform_3(%arg0: i32, %arg1: i32) -> (i32, i32) {
    %c0_i32 = arith.constant 0 : i32
    %c0_i32_0 = arith.constant 0 : i32
    %c0_i32_1 = arith.constant 0 : i32
    return %c0_i32, %c0_i32_0 : i32, i32
  }
  func.func @transform_4(%arg0: i32, %arg1: i32) -> (i32, i32, i32) {
    %c0_i32 = arith.constant 0 : i32
    %c0_i32_0 = arith.constant 0 : i32
    %c0_i32_1 = arith.constant 0 : i32
    return %arg0, %c0_i32, %c0_i32_0 : i32, i32, i32
  }
}

</mosaic_0001>

<bundles_post_ra>
// kernel: tpu_custom_call.1
= control target key start
LH: loop header
LB: loop body
LE: loop exit
PB: predicated region body
PF: predicated region fallthrough
CT: control target
= control target key end

     0   :  { %9 = vsyncpa [#allocation4], 0  ;;  %s1007_s0 = inlined_call_operand.vmem [shape: bf16[2,8,256], index: 0, kind: input, shape index: {}]   ;;  %s1008_s1 = inlined_call_operand.vmem [shape: bf16[256,50], index: 1, kind: input, shape index: {}]   ;;  %s1009_s2 = inlined_call_operand.vmem [shape: bf16[8,8], index: 2, kind: input, shape index: {}]   ;;  %s1010_s3 = inlined_call_operand.vmem [shape: f32[8,1], index: 3, kind: input, shape index: {}]   ;;  %s1011_s4 = inlined_call_operand.hbm [shape: bf16[2,8,50], index: 4, kind: output, shape index: {}]  }
   0x1   :  { %11 = vsyncpa [#allocation4 + $0x1], 0  ;;  %s846_s15 = smov 0   ;;  %s848_s16 = smov 0  }
   0x2   :  { %s850_s17 = smov 0   ;;  %s852_s18 = smov 0  }
   0x3   :  { %s854_s19 = smov 0   ;;  %s856_s20 = smov 0  }
   0x4 LB: > { %s599_s21 = sadd.s32 4294967295, %s815_s20   ;;  %s600_s22 = sadd.s32 4294967294, %s815_s20   ;;  %s815_s20 = sphi %s856_s20, %s17_s20   ;;  %s811_s19 = sphi %s854_s19, %s1018_s19   ;;  %s807_s18 = sphi %s852_s18, %s1017_s18   ;;  %s803_s17 = sphi %s850_s17, %s1016_s17   ;;  %s799_s16 = sphi %s848_s16, %s1015_s16   ;;  %s795_s15 = sphi %s846_s15, %s1014_s15  }
   0x5   : > { %s29_s23 = sadd.s32 1, %s811_s19  ;;  %s132_s24 = sadd.s32 1, %s803_s17 }
   0x6   : > { %p31_p0 = scmp.ge.s32.totalorder %s29_s23, 2  ;;  %p142_p1 = scmp.ne.s32.totalorder %s803_s17, %s799_s16 }
   0x7   : > { %p143_p2 = scmp.eq.s32.totalorder %s599_s21, 1  ;;  %p148_p3 = scmp.ne.s32.totalorder %s799_s16, %s795_s15 }
   0x8   : > { %s1020_s23 = smov (%p31_p0, %s29_s23), 0  ;;  %p149_p5 = scmp.eq.s32.totalorder %s600_s22, 1 }
   0x9   : > { %p886_p4 = por %p143_p2, %p142_p1  ;;  %s129_s26 = ssub.s32 %s811_s19, %s1020_s23 }
   0xa   : > { %p604_p6 = scmp.ge.s32.totalorder %s815_s20, 1  ;;  %p130_p7 = scmp.eq.s32.totalorder %s129_s26, 0 }
   0xb   : > { %p893_p8 = por %p149_p5, %p148_p3  ;;  %p195_p9 = scmp.lt.s32.totalorder %s815_s20, 3 }
   0xc   : > { %s899_s28 = scalar_select %p130_p7, %s803_s17, %s132_s24  }
   0xd   : > { %p196_p10 = pnand %p604_p6, %p195_p9 }
   0xe   : > { %p231_p11 = scmp.lt.s32.totalorder (!%p196_p10), %s807_s18, 1  ;;  %s227_s12 = sand.u32 (!%p196_p10), 1, %s799_s16  }
   0xf   : > { %199 = sbr.rel (%p196_p10) target bundleno = 478 (0x1de), region = 36  ;;  %s628_s14 = sshll.u32 (!%p196_p10), %s807_s18, 6 }
  0x10   : > { %s967_s29 = scalar_lea.hbm (!%p196_p10), %s1011_s4, %s628_s14  ;;  %s498_s30 = scalar_lea.sflag (!%p196_p10), [#allocation4], %s227_s12 }
  0x14   : > { %v721_v0 = vld [vmem:[%s1008_s1 + $0x78] sm:$0xff]   ;;  %v723_v2 = vld [vmem:[%s1008_s1 + $0x70] sm:$0xff]   ;;  %v725_v4 = vld [vmem:[%s1008_s1 + $0x68] sm:$0xff]   ;;  %s232_s13 = scalar_select %p231_p11, %s807_s18, 1  ;;  %vm251_vm0 = vcmask 408576   ;;  %v817_v19 = vmov 0.0  }
  0x15   : > { %v722_v1 = vld [vmem:[%s1008_s1 + $0x38] sm:$0xff]   ;;  %632 = vmatprep.subr.bf16.mxu0 %v721_v0  ;;  %v724_v3 = vld [vmem:[%s1008_s1 + $0x30] sm:$0xff]   ;;  %v726_v5 = vld [vmem:[%s1008_s1 + $0x28] sm:$0xff]   ;;  %252 = vst.msk [vmem:[#allocation2] sm:$0xff] %vm251_vm0, %v817_v19  ;;  %656 = vmatprep.subr.bf16.mxu1 %v817_v19  ;;  %vm818_vm1 = vmmov 0   ;;  %v819_v21 = vmov 0  }
  0x16   : > { %633 = vmatpush3.bf16.msra.mxu0 %v722_v1  ;;  %v727_v6 = vld [vmem:[%s1008_s1 + $0x60] sm:$0xff]   ;;  %s631_s26 = sshll.u32 %s232_s13, 3  ;;  %v729_v8 = vld [vmem:[%s1008_s1 + $0x58] sm:$0xff]   ;;  %v731_v10 = vld [vmem:[%s1008_s1 + $0x50] sm:$0xff]   ;;  %658 = vmatprep.mubr.msk.bf16.mxu1 %vm818_vm1, %v817_v19  ;;  %vm449_vm2 = vcmask 1043456   ;;  %vm445_vm3 = vcmask 64512  }
  0x17   : > { %634 = vmatprep.subr.bf16.mxu0 %v723_v2  ;;  %v728_v7 = vld [vmem:[%s1008_s1 + $0x20] sm:$0xff]   ;;  %s238_s9 = scalar_lea.vmem %s1007_s0, %s631_s26  ;;  %v730_v9 = vld [vmem:[%s1008_s1 + $0x18] sm:$0xff]   ;;  %v732_v13 = vld [vmem:[%s1008_s1 + $0x10] sm:$0xff]   ;;  %720 = vset.pattern.permute.xlu0 %v819_v21  ;;  %s605_s13 = sshll.u32 %s227_s12, 2  ;;  %vm495_vm4 = vcmask 404480  }
  0x18   : > { %v254_v11 = vld [vmem:[%s238_s9] sm:$0xff]  ;;  %v733_v14 = vld [vmem:[%s1008_s1 + $0x48] sm:$0xff]   ;;  %s229_s21 = scalar_lea.vmem [#allocation3], %s605_s13  ;;  %s820_s18 = smov [#allocation3]  }
  0x19   : > { %v609_v12 = vcombine.high %v254_v11, %v254_v11  ;;  %v734_v15 = vld [vmem:[%s1008_s1 + $0x8] sm:$0xff]   ;;  %v735_v16 = vld [vmem:[%s1008_s1 + $0x40] sm:$0xff]   ;;  %v608_v18 = vcombine.low %v254_v11, %v254_v11  ;;  %s511_s22 = sshll.u32 %s229_s21, 4  ;;  %s743_s6 = sshll.u32 %s820_s18, 4  ;;  %s512_s22 = int_to_ptr.vmem [resolvable:$true] %s511_s22  ;;  %s744_s6 = int_to_ptr.vmem [resolvable:$false] %s743_s6 }
  0x1a   : > { %635 = vmatpush3.bf16.msra.mxu0 %v724_v3  ;;  %v736_v17 = vld [vmem:[%s1008_s1] sm:$0xff]   ;;  %s739_s5 = scalar_lea.vmem %s512_s22, 64  ;;  %s745_s7 = scalar_lea.vmem %s744_s6, 128 }
  0x1b   : > { %636 = vmatprep.subr.bf16.mxu0 %v725_v4  ;;  %422 = vmatprep.mubr.bf16.mxu0 %v609_v12  ;;  %v439_v20 = vld [vmem:[%s1010_s3] sm:$0xff]  ;;  %p740_p12 = scmp.ne.s32.totalorder %s512_s22, %s739_s5  ;;  %p746_p1 = scmp.lt.s32.totalorder %s512_s22, %s744_s6 }
  0x1c   : > { %442 = vperm.xlu0 %720, %v439_v20   ;;  %v253_v24 = vld [vmem:[#allocation2] sm:$0xff]  ;;  %p747_p2 = scmp.lt.s32.totalorder %s745_s7, %s739_s5 }
  0x1d   : > { %v436_v32 = vld [vmem:[%s1009_s2] sm:$0xf]  ;;  %p741_p13 = pnand %p740_p12, %p886_p4 }
  0x1e   : > { %637 = vmatpush3.bf16.msra.mxu0 %v726_v5  ;;  %p748_p3 = por %p747_p2, %p746_p1 }
  0x1f   : > { %638 = vmatprep.subr.bf16.mxu0 %v727_v6  ;;  %p742_p0 = pneg %p741_p13 }
  0x21   : > { %p749_p5 = pnand %p748_p3, %p742_p0 }
  0x22   : > { %639 = vmatpush3.bf16.msra.mxu0 %v728_v7 }
  0x23   : > { %640 = vmatprep.subr.bf16.mxu0 %v729_v8 }
  0x26   : > { %641 = vmatpush3.bf16.msra.mxu0 %v730_v9 }
  0x27   : > { %642 = vmatprep.subr.bf16.mxu0 %v731_v10 }
  0x2a   : > { %643 = vmatpush3.bf16.msra.mxu0 %v732_v13 }
  0x2b   : > { %644 = vmatprep.subr.bf16.mxu0 %v733_v14 }
  0x2e   : > { %645 = vmatpush3.bf16.msra.mxu0 %v734_v15 }
  0x2f   : > { %646 = vmatprep.subr.bf16.mxu0 %v735_v16 }
  0x32   : > { %647 = vmatpush3.bf16.msra.mxu0 %v736_v17 }
  0x35   : > { %423 = vmatmul.mubr.bf16.vlgmr.msra.gmra.mxu0 %v608_v18 }
  0x97   : > { %v443_v33 = vpop.permute.xlu0 %442 }
  0xf5   : > { %v648_v22 = vpop.f32.mrf.mxu0 }
  0xf7   : > { %v649_v23 = vpop.f32.mrf.mxu0 }
  0xf8   : > { %v650_v25 = vadd.f32 %v649_v23, %v648_v22 }
  0xf9   : > { %v651_v26 = vpop.f32.mrf.mxu0 }
  0xfa   : > { %v430_v27 = vadd.f32 %v650_v25, %v253_v24 }
  0xfb   : > { %v652_v28 = vpop.f32.mrf.mxu0 }
  0xfc   : > { %432 = vst.msk [vmem:[#allocation2] sm:$0xff] %vm251_vm0, %v430_v27 }
 0x103   : > { %v437_v29 = vld [vmem:[#allocation2] sm:$0xff] }
 0x104   : > { %v438_v30 = vpack.c.bf16 %v437_v29, %v437_v29 }
 0x106   : > { %v451_v31 = vsel %vm449_vm2, %v438_v30, 0 }
 0x107   : > { %657 = vmatpush3.bf16.msra.mxu1 %v451_v31 }
 0x10a   : > { %659 = vmatmul.mubr.msk.bf16.vlgmr.msra.gmra.mxu1 %vm445_vm3, %v436_v32 }
 0x1ca   : > { %v487_v34 = vpop.f32.mrf.mxu1 }
 0x1cb   : > { %v488_v35 = vadd.f32 %v487_v34, %v443_v33 }
 0x1cc   : > { %v660_v36 = vpop.f32.mrf.mxu1 }
 0x1cd   : > { %v493_v37 = vmax.f32 %v488_v35, 0.0 }
 0x1ce   : > { %v490_v38 = vpop.f32.mrf.mxu1 }
 0x1cf   : > { %v494_v39 = vpack.c.bf16 %v493_v37, %v493_v37 }
 0x1d0   : > { %v661_v40 = vpop.f32.mrf.mxu1 }
 0x1d1   : > { %496 = vst.msk [vmem:[%s229_s21] sm:$0xf] %vm495_vm4, %v494_v39 }
 0x1d2   : > { %752 = shalt.err (!%p749_p5)
}
 0x1d3   : > { %s753_s8 = scalar_lea.hbm %s967_s29, 64  ;;  %s757_s11 = scalar_lea.hbm %s1011_s4, 128 }
 0x1d4   : > { %p754_p6 = scmp.ne.s32.totalorder %s967_s29, %s753_s8  ;;  %p758_p10 = scmp.lt.s32.totalorder %s967_s29, %s1011_s4 }
 0x1d5   : > { %p759_p11 = scmp.lt.s32.totalorder %s757_s11, %s753_s8 }
 0x1d6   : > { %p755_p7 = pnand %p754_p6, %p886_p4 }
 0x1d7   : > { %p760_p12 = por %p759_p11, %p758_p10 }
 0x1d8   : > { %p756_p9 = pneg %p755_p7 }
 0x1da   : > { %p761_p13 = pnand %p760_p12, %p756_p9 }
 0x1dc   : > { %764 = shalt.err (!%p761_p13)
}
 0x1dd   : > { %662 = dma.vmem_to_hbm [thread:$0]  (%p886_p4), %s512_s22, 64, %s967_s29, %s498_s30  }
 0x1de PF: > { %p668_p0 = scmp.ge.s32.totalorder %s815_s20, 2  ;;  %s523_s14 = sand.u32 1, %s795_s15  }
 0x1df   : > { %s524_s21 = scalar_lea.sflag [#allocation4], %s523_s14 }
 0x1e0   : > { %p665_p1 = pnand %p668_p0, %p893_p8 }
 0x1e2   : > { %p666_p2 = pneg %p665_p1 }
 0x1e4   : > { %790 = dma.done.wait (%p666_p2), %s524_s21, 64  }
 0x1e5   : > { %792 = vsyncadd (%p666_p2), %s524_s21, 4294967232  ;;  %s17_s20 = sadd.s32 1, %s815_s20   ;;  %s1014_s15 = smov %s799_s16 }
 0x1e6   : > { %p14_p3 = scmp.ge.s32.totalorder %s17_s20, 4   ;;  %s1015_s16 = smov %s803_s17 }
 0x1e7   : > { %s1016_s17 = smov %s899_s28  ;;  %s1017_s18 = smov %s811_s19 }
 0x1e8   : > { %s1018_s19 = smov %s1020_s23  ;;  %16 = sbr.rel (!%p14_p3) target bundleno = 4 (0x4), region = 82 }
 0x1ed   :  { %529 = vsyncpa [#allocation4], 1 }
 0x1ee   :  { %531 = vsyncpa [#allocation4 + $0x1], 1 }

</bundles_post_ra>
